<compile_context>
chip_gen: v6e
topology: v6e:2x2x1
jax: 0.10.0
libtpu: 0.0.40
codegen_flags: <defaults>
</compile_context>

<pallas_src>
import functools
import math

import jax
import jax.numpy as jnp
from jax.experimental import pallas as pl
from jax.experimental.pallas import tpu as pltpu


def _round_up(x, m):
    return ((x + m - 1) // m) * m


def _block_diag(w, g):
    """(fi, fo) -> (g*fi, g*fo) block-diagonal replication of w."""
    if g == 1:
        return w
    fi, fo = w.shape
    out = jnp.zeros((g * fi, g * fo), w.dtype)
    for i in range(g):
        out = out.at[i * fi:(i + 1) * fi, i * fo:(i + 1) * fo].set(w)
    return out


def prepare_params(params, *, input_channels, hidden_channels,
                   use_bf16_matmul=True, pack_group=None):
    """One-time parameter preparation (hoist out of the per-step call path).

    params: dict with 'w_in'(hc,hh), 'b_in'(1,hh), 'w_hs' list (hh,hh),
            'b_hs' list (1,hh), 'w_out'(hh, hc*ic), 'b_out'(1, hc*ic).
    Returns a prepared dict with lane-packed (block-diagonal) weights.
    """
    hc = hidden_channels
    hh = params["w_in"].shape[1]
    out_dim = hidden_channels * input_channels
    mm_dtype = jnp.bfloat16 if use_bf16_matmul else jnp.float32
    g = pack_group if pack_group is not None else max(1, 128 // hc)

    raw_layers = ([(params["w_in"], params["b_in"])]
                  + list(zip(params["w_hs"], params["b_hs"]))
                  + [(params["w_out"], params["b_out"])])
    layers = []
    for w, b in raw_layers:
        wp = _block_diag(w, g).astype(mm_dtype)
        bp = (jnp.tile(b, (1, g)) if g > 1 else b).astype(jnp.float32)
        layers.append((wp, bp))

    return dict(layers=layers, G=g, hc=hc, hh=hh, out_dim=out_dim,
                mm_dtype=mm_dtype, input_channels=input_channels,
                hidden_channels=hidden_channels)


def _packed_mlp_tanh_kernel(*refs, n_layers, matmul_dtype, tanh_dtype):
    # refs = (x_ref, w0, b0, w1, b1, ..., o_ref); all lane-packed.
    x_ref = refs[0]
    o_ref = refs[-1]
    p = refs[1:-1]

    h = x_ref[...]
    for li in range(n_layers):
        w = p[2 * li][...]
        b = p[2 * li + 1][...]
        h = jnp.dot(h.astype(matmul_dtype), w,
                    preferred_element_type=jnp.float32) + b
        if li < n_layers - 1:
            h = jnp.maximum(h, 0.0)
    o_ref[...] = jnp.tanh(h.astype(tanh_dtype)).astype(o_ref.dtype)


def final_tanh_f_pallas(z, params, *, input_channels, hidden_channels,
                        tm=1024, out_dtype=None, input_buffers=2,
                        use_bf16_matmul=True):
    """Fused forward of FinalTanh_f.

    z: (..., hidden_channels) float32
    params: raw param dict (see prepare_params) OR an already-prepared dict.
            Prefer preparing once and reusing: this field is evaluated every
            ODE-solver step.
    returns: (..., hidden_channels, input_channels)
    """
    if "layers" not in params:
        params = prepare_params(params, input_channels=input_channels,
                                hidden_channels=hidden_channels,
                                use_bf16_matmul=use_bf16_matmul)
    assert params["input_channels"] == input_channels
    assert params["hidden_channels"] == hidden_channels

    g = params["G"]
    hc = params["hc"]
    hh = params["hh"]
    out_dim = params["out_dim"]
    layers = params["layers"]
    mm_dtype = params["mm_dtype"]
    n_layers = len(layers)

    lead_shape = z.shape[:-1]
    assert z.shape[-1] == hc
    M = math.prod(lead_shape) if lead_shape else 1
    out_dtype = z.dtype if out_dtype is None else jnp.dtype(out_dtype)
    tanh_dtype = jnp.bfloat16 if out_dtype == jnp.bfloat16 else jnp.float32

    packed_in = g * hc
    packed_out = g * out_dim

    # ---- row tiling in *packed* rows (each packed row = g original rows) ---
    m_g = pl.cdiv(M, g)                       # packed rows of real data
    tm = max(8, _round_up(int(tm), 8))
    n_steps = max(1, pl.cdiv(m_g, tm))
    # v7x has 2 TensorCores: when there is enough work, keep >= 2 grid steps
    # so the "parallel" axis can be sharded across both cores.
    if n_steps == 1 and m_g > 16:
        n_steps = 2
    tm_eff = max(8, _round_up(pl.cdiv(m_g, n_steps), 8))
    m_g_p = n_steps * tm_eff                  # padded packed rows
    M_p = m_g_p * g                           # padded original rows
    grid = (n_steps,)

    # ---- pack rows into lane groups (contiguous reshapes => free) ----------
    x2d = z.reshape(M, hc)
    if M_p != M:
        x2d = jnp.pad(x2d, ((0, M_p - M), (0, 0)))
    x_packed = x2d.reshape(m_g_p, packed_in)

    # ---- specs --------------------------------------------------------------
    def full_spec(shape):
        # whole array resident in VMEM; constant block index across the grid,
        # so a single buffer suffices.
        nd = len(shape)
        return pl.BlockSpec(shape, lambda *_: (0,) * nd,
                            pipeline_mode=pl.Buffered(1))

    if input_buffers == 2:
        x_spec = pl.BlockSpec((tm_eff, packed_in), lambda i: (i, 0))
    else:
        x_spec = pl.BlockSpec((tm_eff, packed_in), lambda i: (i, 0),
                              pipeline_mode=pl.Buffered(int(input_buffers)))

    operands = [x_packed]
    in_specs = [x_spec]
    for w, b in layers:
        operands += [w, b]
        in_specs += [full_spec(w.shape), full_spec(b.shape)]
    out_specs = pl.BlockSpec((tm_eff, packed_out), lambda i: (i, 0))

    # ---- cost estimate (dense MXU work actually performed) -----------------
    param_bytes = sum(int(w.size) * w.dtype.itemsize
                      + int(b.size) * b.dtype.itemsize for w, b in layers)
    flops = 0
    for w, _ in layers:
        flops += 2 * m_g_p * int(w.shape[0]) * int(w.shape[1])
    out_itemsize = jnp.dtype(out_dtype).itemsize
    cost = pl.CostEstimate(
        flops=int(flops),
        transcendentals=int(m_g_p * packed_out),
        bytes_accessed=int(x_packed.size) * x_packed.dtype.itemsize
        + m_g_p * packed_out * out_itemsize + param_bytes,
    )

    # ---- VMEM budget: only raise the scoped limit when tiles need it -------
    h_width = max(g * hh, packed_out)
    vmem_need = (int(input_buffers) * tm_eff * packed_in * x_packed.dtype.itemsize
                 + 2 * tm_eff * packed_out * out_itemsize
                 + 2 * tm_eff * h_width * 4          # f32 intermediates
                 + param_bytes + (1 << 20))
    try:
        vmem_phys = int(pltpu.get_tpu_info().vmem_capacity_bytes)
    except Exception:
        vmem_phys = 64 << 20                         # conservative (v7x-sized)
    vmem_cap = (vmem_phys * 5) // 8                  # ~40 MiB on v7x, ~80 MiB on v5e/v6e
    cp_kwargs = dict(dimension_semantics=("parallel",))
    if vmem_need > (16 << 20):
        cp_kwargs["vmem_limit_bytes"] = int(min(2 * vmem_need, vmem_cap))
    compiler_params = pltpu.CompilerParams(**cp_kwargs)

    kernel = functools.partial(_packed_mlp_tanh_kernel,
                               n_layers=n_layers,
                               matmul_dtype=mm_dtype,
                               tanh_dtype=tanh_dtype)

    out_packed = pl.pallas_call(
        kernel,
        out_shape=jax.ShapeDtypeStruct((m_g_p, packed_out), out_dtype),
        grid_spec=pltpu.PrefetchScalarGridSpec(
            num_scalar_prefetch=0,
            grid=grid,
            in_specs=in_specs,
            out_specs=out_specs,
        ),
        compiler_params=compiler_params,
        cost_estimate=cost,
    )(*operands)

    # Unpack: contiguous reshape; row crop stays fused with the final reshape
    # (padding is at most a few rows thanks to the tm_eff choice).
    out2d = out_packed.reshape(M_p, out_dim)
    if M_p != M:
        out2d = out2d[:M]
    # Matches torch: .view(*z.shape[:-1], hidden_channels, input_channels)
    return out2d.reshape(*lead_shape, hidden_channels, input_channels)


def init_params(key, input_channels, hidden_channels, hidden_hidden_channels,
                num_hidden_layers):
    """Deterministic init mirroring nn.Linear default (uniform +/- 1/sqrt(fan_in)).

    Weights stored transposed relative to PyTorch, i.e. (in, out), so the
    kernel computes x @ W + b directly.
    """
    def linear(key, fan_in, fan_out):
        kw, kb = jax.random.split(key)
        bound = 1.0 / jnp.sqrt(fan_in)
        w = jax.random.uniform(kw, (fan_in, fan_out), jnp.float32, -bound, bound)
        b = jax.random.uniform(kb, (1, fan_out), jnp.float32, -bound, bound)
        return w, b

    keys = jax.random.split(key, num_hidden_layers + 1)
    w_in, b_in = linear(keys[0], hidden_channels, hidden_hidden_channels)
    w_hs, b_hs = [], []
    for i in range(num_hidden_layers - 1):
        w, b = linear(keys[1 + i], hidden_hidden_channels, hidden_hidden_channels)
        w_hs.append(w)
        b_hs.append(b)
    w_out, b_out = linear(keys[-1], hidden_hidden_channels,
                          input_channels * hidden_channels)
    return dict(w_in=w_in, b_in=b_in, w_hs=w_hs, b_hs=b_hs,
                w_out=w_out, b_out=b_out)


def reference_forward(z, params, *, input_channels, hidden_channels):
    h = jnp.maximum(z @ params["w_in"] + params["b_in"][0], 0.0)
    for w, b in zip(params["w_hs"], params["b_hs"]):
        h = jnp.maximum(h @ w + b[0], 0.0)
    y = jnp.tanh(h @ params["w_out"] + params["b_out"][0])
    return y.reshape(*z.shape[:-1], hidden_channels, input_channels)


if __name__ == "__main__":
    input_channels = 4
    hidden_channels = 32
    hidden_hidden_channels = 32
    num_hidden_layers = 2   # -> 1 hidden linear in self.linears

    batch, seq = 2, 8       # z: (batch, seq, hidden_channels)

    key = jax.random.PRNGKey(0)
    kz, kp, kz2 = jax.random.split(key, 3)
    z = jax.random.normal(kz, (batch, seq, hidden_channels), jnp.float32)
    params = init_params(kp, input_channels, hidden_channels,
                         hidden_hidden_channels, num_hidden_layers)
    ref = reference_forward(z, params,
                            input_channels=input_channels,
                            hidden_channels=hidden_channels)

    # Hoisted one-time parameter prep (block-diag lane packing + dtype cast).
    prep_bf16 = prepare_params(params, input_channels=input_channels,
                               hidden_channels=hidden_channels,
                               use_bf16_matmul=True)
    prep_f32 = prepare_params(params, input_channels=input_channels,
                              hidden_channels=hidden_channels,
                              use_bf16_matmul=False)

    # Default path: bf16 MXU inputs, f32 accumulation, f32 output.
    out = final_tanh_f_pallas(z, prep_bf16,
                              input_channels=input_channels,
                              hidden_channels=hidden_channels)
    out = jax.block_until_ready(out)
    assert out.shape == (batch, seq, hidden_channels, input_channels), out.shape
    assert jnp.allclose(out, ref, atol=2e-2, rtol=2e-2), "bf16 path mismatch"

    # f32 MXU path: exact semantics check against the JAX reference.
    out_f32 = final_tanh_f_pallas(z, prep_f32,
                                  input_channels=input_channels,
                                  hidden_channels=hidden_channels)
    out_f32 = jax.block_until_ready(out_f32)
    assert jnp.allclose(out_f32, ref, atol=1e-5, rtol=1e-5), "f32 path mismatch"

    # bf16 output / bf16 tanh path (halves the dominant output HBM stream).
    out_bf16 = final_tanh_f_pallas(z, prep_bf16,
                                   input_channels=input_channels,
                                   hidden_channels=hidden_channels,
                                   out_dtype=jnp.bfloat16)
    out_bf16 = jax.block_until_ready(out_bf16)
    assert out_bf16.dtype == jnp.bfloat16
    assert jnp.allclose(out_bf16.astype(jnp.float32), ref,
                        atol=5e-2, rtol=5e-2), "bf16-output path mismatch"

    # Non-divisible row count -> exercises row padding, lane packing with a
    # ragged tail, and a multi-step grid (>=2 steps for v7x dual-TC).
    z2 = jax.random.normal(kz2, (3, 100, hidden_channels), jnp.float32)
    ref2 = reference_forward(z2, params,
                             input_channels=input_channels,
                             hidden_channels=hidden_channels)
    out2 = final_tanh_f_pallas(z2, prep_bf16,
                               input_channels=input_channels,
                               hidden_channels=hidden_channels,
                               tm=128)
    out2 = jax.block_until_ready(out2)
    assert out2.shape == (3, 100, hidden_channels, input_channels), out2.shape
    assert jnp.allclose(out2, ref2, atol=2e-2, rtol=2e-2), "padded path mismatch"

    print("KERNEL_OK")
</pallas_src>

<mosaic_0001>
module attributes {stable_mosaic.version = 11 : i64} {
  func.func @_packed_mlp_tanh_kernel(%arg0: i32, %arg1: memref<8x128xf32, #tpu.memory_space<vmem>>, %arg2: memref<128x128xbf16, #tpu.memory_space<vmem>>, %arg3: memref<1x128xf32, #tpu.memory_space<vmem>>, %arg4: memref<128x128xbf16, #tpu.memory_space<vmem>>, %arg5: memref<1x128xf32, #tpu.memory_space<vmem>>, %arg6: memref<128x512xbf16, #tpu.memory_space<vmem>>, %arg7: memref<1x512xf32, #tpu.memory_space<vmem>>, %arg8: memref<8x512xf32, #tpu.memory_space<vmem>>) attributes {dimension_semantics = [#tpu.dimension_semantics<parallel>], iteration_bounds = array<i64: 1>, scalar_prefetch = 0 : i64, scratch_operands = 0 : i64, tpu.core_type = #tpu.core_type<tc>, window_params = [{transform_indices = @transform_0, window_bounds = array<i64: 8, 128>}, {pipeline_mode = #tpu.pipeline_mode<synchronous>, transform_indices = @transform_1, window_bounds = array<i64: 128, 128>}, {pipeline_mode = #tpu.pipeline_mode<synchronous>, transform_indices = @transform_2, window_bounds = array<i64: 1, 128>}, {pipeline_mode = #tpu.pipeline_mode<synchronous>, transform_indices = @transform_3, window_bounds = array<i64: 128, 128>}, {pipeline_mode = #tpu.pipeline_mode<synchronous>, transform_indices = @transform_4, window_bounds = array<i64: 1, 128>}, {pipeline_mode = #tpu.pipeline_mode<synchronous>, transform_indices = @transform_5, window_bounds = array<i64: 128, 512>}, {pipeline_mode = #tpu.pipeline_mode<synchronous>, transform_indices = @transform_6, window_bounds = array<i64: 1, 512>}, {transform_indices = @transform_7, window_bounds = array<i64: 8, 512>}]} {
    %c0 = arith.constant 0 : index
    %c0_0 = arith.constant 0 : index
    %0 = vector.load %arg1[%c0, %c0_0] : memref<8x128xf32, #tpu.memory_space<vmem>>, vector<8x128xf32>
    %c0_1 = arith.constant 0 : index
    %c0_2 = arith.constant 0 : index
    %1 = vector.load %arg2[%c0_1, %c0_2] : memref<128x128xbf16, #tpu.memory_space<vmem>>, vector<128x128xbf16>
    %c0_3 = arith.constant 0 : index
    %c0_4 = arith.constant 0 : index
    %2 = vector.load %arg3[%c0_3, %c0_4] : memref<1x128xf32, #tpu.memory_space<vmem>>, vector<1x128xf32>
    %3 = arith.truncf %0 : vector<8x128xf32> to vector<8x128xbf16>
    %cst = arith.constant dense<0.000000e+00> : vector<8x128xf32>
    %4 = tpu.matmul %3, %1, %cst {dimension_numbers = #tpu.dot_dimension_numbers<[1], [0], [0], [1], [0, 0, 1, 1], [], []>} : vector<8x128xbf16>, vector<128x128xbf16>, vector<8x128xf32> -> vector<8x128xf32>
    %5 = vector.broadcast %2 : vector<1x128xf32> to vector<8x128xf32>
    %6 = arith.addf %4, %5 : vector<8x128xf32>
    %cst_5 = arith.constant 0.000000e+00 : f32
    %7 = vector.broadcast %cst_5 : f32 to vector<8x128xf32>
    %8 = arith.maximumf %6, %7 : vector<8x128xf32>
    %c0_6 = arith.constant 0 : index
    %c0_7 = arith.constant 0 : index
    %9 = vector.load %arg4[%c0_6, %c0_7] : memref<128x128xbf16, #tpu.memory_space<vmem>>, vector<128x128xbf16>
    %c0_8 = arith.constant 0 : index
    %c0_9 = arith.constant 0 : index
    %10 = vector.load %arg5[%c0_8, %c0_9] : memref<1x128xf32, #tpu.memory_space<vmem>>, vector<1x128xf32>
    %11 = arith.truncf %8 : vector<8x128xf32> to vector<8x128xbf16>
    %cst_10 = arith.constant dense<0.000000e+00> : vector<8x128xf32>
    %12 = tpu.matmul %11, %9, %cst_10 {dimension_numbers = #tpu.dot_dimension_numbers<[1], [0], [0], [1], [0, 0, 1, 1], [], []>} : vector<8x128xbf16>, vector<128x128xbf16>, vector<8x128xf32> -> vector<8x128xf32>
    %13 = vector.broadcast %10 : vector<1x128xf32> to vector<8x128xf32>
    %14 = arith.addf %12, %13 : vector<8x128xf32>
    %cst_11 = arith.constant 0.000000e+00 : f32
    %15 = vector.broadcast %cst_11 : f32 to vector<8x128xf32>
    %16 = arith.maximumf %14, %15 : vector<8x128xf32>
    %c0_12 = arith.constant 0 : index
    %c0_13 = arith.constant 0 : index
    %17 = vector.load %arg6[%c0_12, %c0_13] : memref<128x512xbf16, #tpu.memory_space<vmem>>, vector<128x512xbf16>
    %c0_14 = arith.constant 0 : index
    %c0_15 = arith.constant 0 : index
    %18 = vector.load %arg7[%c0_14, %c0_15] : memref<1x512xf32, #tpu.memory_space<vmem>>, vector<1x512xf32>
    %19 = arith.truncf %16 : vector<8x128xf32> to vector<8x128xbf16>
    %cst_16 = arith.constant dense<0.000000e+00> : vector<8x512xf32>
    %20 = tpu.matmul %19, %17, %cst_16 {dimension_numbers = #tpu.dot_dimension_numbers<[1], [0], [0], [1], [0, 0, 1, 1], [], []>} : vector<8x128xbf16>, vector<128x512xbf16>, vector<8x512xf32> -> vector<8x512xf32>
    %21 = vector.broadcast %18 : vector<1x512xf32> to vector<8x512xf32>
    %22 = arith.addf %20, %21 : vector<8x512xf32>
    %23 = math.tanh %22 : vector<8x512xf32>
    %c0_17 = arith.constant 0 : index
    %c0_18 = arith.constant 0 : index
    %24 = vector.load %arg8[%c0_17, %c0_18] : memref<8x512xf32, #tpu.memory_space<vmem>>, vector<8x512xf32>
    tpu.vector_store %arg8[%c0_17, %c0_18], %23 {strides = array<i32>} : memref<8x512xf32, #tpu.memory_space<vmem>>, vector<8x512xf32>,
    return
  }
  func.func @transform_0(%arg0: i32) -> (i32, i32) {
    %c0_i32 = arith.constant 0 : i32
    %c0_i32_0 = arith.constant 0 : i32
    return %arg0, %c0_i32 : i32, i32
  }
  func.func @transform_1(%arg0: i32) -> (i32, i32) {
    %c0_i32 = arith.constant 0 : i32
    %c0_i32_0 = arith.constant 0 : i32
    %c0_i32_1 = arith.constant 0 : i32
    return %c0_i32, %c0_i32_0 : i32, i32
  }
  func.func @transform_2(%arg0: i32) -> (i32, i32) {
    %c0_i32 = arith.constant 0 : i32
    %c0_i32_0 = arith.constant 0 : i32
    %c0_i32_1 = arith.constant 0 : i32
    return %c0_i32, %c0_i32_0 : i32, i32
  }
  func.func @transform_3(%arg0: i32) -> (i32, i32) {
    %c0_i32 = arith.constant 0 : i32
    %c0_i32_0 = arith.constant 0 : i32
    %c0_i32_1 = arith.constant 0 : i32
    return %c0_i32, %c0_i32_0 : i32, i32
  }
  func.func @transform_4(%arg0: i32) -> (i32, i32) {
    %c0_i32 = arith.constant 0 : i32
    %c0_i32_0 = arith.constant 0 : i32
    %c0_i32_1 = arith.constant 0 : i32
    return %c0_i32, %c0_i32_0 : i32, i32
  }
  func.func @transform_5(%arg0: i32) -> (i32, i32) {
    %c0_i32 = arith.constant 0 : i32
    %c0_i32_0 = arith.constant 0 : i32
    %c0_i32_1 = arith.constant 0 : i32
    return %c0_i32, %c0_i32_0 : i32, i32
  }
  func.func @transform_6(%arg0: i32) -> (i32, i32) {
    %c0_i32 = arith.constant 0 : i32
    %c0_i32_0 = arith.constant 0 : i32
    %c0_i32_1 = arith.constant 0 : i32
    return %c0_i32, %c0_i32_0 : i32, i32
  }
  func.func @transform_7(%arg0: i32) -> (i32, i32) {
    %c0_i32 = arith.constant 0 : i32
    %c0_i32_0 = arith.constant 0 : i32
    return %arg0, %c0_i32 : i32, i32
  }
}

</mosaic_0001>

<bundles_post_ra>
// kernel: tpu_custom_call.1
= control target key start
LH: loop header
LB: loop body
LE: loop exit
PB: predicated region body
PF: predicated region fallthrough
CT: control target
= control target key end

     0   :  { %12 = vsyncpa [#allocation3], 0  ;;  %s1006_s0 = inlined_call_operand.hbm [shape: f32[8,128], index: 0, kind: input, shape index: {}]   ;;  %s1007_s1 = inlined_call_operand.hbm [shape: bf16[128,128], index: 1, kind: input, shape index: {}]   ;;  %s1008_s2 = inlined_call_operand.vmem [shape: f32[1,128], index: 2, kind: input, shape index: {}]   ;;  %s1009_s3 = inlined_call_operand.hbm [shape: bf16[128,128], index: 3, kind: input, shape index: {}]   ;;  %s1010_s4 = inlined_call_operand.vmem [shape: f32[1,128], index: 4, kind: input, shape index: {}]   ;;  %s1011_s5 = inlined_call_operand.hbm [shape: bf16[128,512], index: 5, kind: input, shape index: {}]   ;;  %s1012_s6 = inlined_call_operand.vmem [shape: f32[1,512], index: 6, kind: input, shape index: {}]   ;;  %s1013_s7 = inlined_call_operand.hbm [shape: f32[8,512], index: 7, kind: output, shape index: {}]  }
   0x1   :  { %13 = vsyncpa [#allocation6], 0 }
   0x2   :  { %14 = vsyncpa [#allocation9], 0 }
   0x3   :  { %15 = vsyncpa [#allocation4], 0  ;;  %s930_s24 = smov [#allocation5]  }
   0x4   :  { %s31_s25 = sshll.u32 %s930_s24, 4  ;;  %s32_s25 = int_to_ptr.vmem [resolvable:$true] %s31_s25 }
   0x5   :  { %s830_s26 = scalar_lea.vmem %s32_s25, 1024  ;;  %p835_p1 = scmp.lt.s32.totalorder %s32_s25, %s32_s25 }
   0x6   :  { %p831_p0 = scmp.ne.s32.totalorder %s32_s25, %s830_s26  ;;  %p836_p2 = scmp.lt.s32.totalorder %s830_s26, %s830_s26 }
   0x8   :  { %p837_p3 = por %p836_p2, %p835_p1 }
   0xa   :  { %p838_p4 = pnand %p837_p3, %p831_p0 }
   0xc   :  { %841 = shalt.err (!%p838_p4)
}
   0xd   :  { %s931_s27 = smov 64   ;;  %s932_s28 = smov 4  }
   0xe   :  { %37 = dma.hbm_to_vmem [thread:$0]  %s1007_s1, 1024, %s32_s25, [#allocation6], %s931_s27, %s931_s27, %s932_s28  }
   0xf   :  { %s933_s8 = smov [#allocation2]   ;;  %s934_s10 = smov [#allocation7]  }
  0x10   :  { %s22_s9 = sshll.u32 %s933_s8, 4  ;;  %s45_s11 = sshll.u32 %s934_s10, 4  ;;  %s23_s9 = int_to_ptr.vmem [resolvable:$true] %s22_s9  ;;  %s46_s11 = int_to_ptr.vmem [resolvable:$true] %s45_s11 }
  0x11   :  { %s850_s12 = scalar_lea.vmem %s23_s9, 128  ;;  %p855_p6 = scmp.lt.s32.totalorder %s23_s9, %s23_s9 }
  0x12   :  { %p851_p5 = scmp.ne.s32.totalorder %s23_s9, %s850_s12  ;;  %p856_p7 = scmp.lt.s32.totalorder %s850_s12, %s850_s12 }
  0x14   :  { %p857_p8 = por %p856_p7, %p855_p6 }
  0x16   :  { %p858_p9 = pnand %p857_p8, %p851_p5 }
  0x18   :  { %861 = shalt.err (!%p858_p9)
}
  0x19   :  { %25 = dma.hbm_to_vmem [thread:$0]  %s1006_s0, 128, %s23_s9, [#allocation3]  }
  0x1a   :  { %s870_s15 = scalar_lea.vmem %s46_s11, 1024  ;;  %p875_p11 = scmp.lt.s32.totalorder %s46_s11, %s46_s11 }
  0x1b   :  { %p871_p10 = scmp.ne.s32.totalorder %s46_s11, %s870_s15  ;;  %p876_p12 = scmp.lt.s32.totalorder %s870_s15, %s870_s15 }
  0x1d   :  { %p877_p13 = por %p876_p12, %p875_p11 }
  0x1f   :  { %p878_p0 = pnand %p877_p13, %p871_p10 }
  0x21   :  { %881 = shalt.err (!%p878_p0)
}
  0x22   :  { %51 = dma.hbm_to_vmem [thread:$0]  %s1009_s3, 1024, %s46_s11, [#allocation6], %s931_s27, %s931_s27, %s932_s28  }
  0x23   :  { %s935_s17 = smov [#allocation8]  }
  0x24   :  { %s59_s18 = sshll.u32 %s935_s17, 4  ;;  %s60_s18 = int_to_ptr.vmem [resolvable:$true] %s59_s18 }
  0x25   :  { %s890_s19 = scalar_lea.vmem %s60_s18, 4096  ;;  %p895_p2 = scmp.lt.s32.totalorder %s60_s18, %s60_s18 }
  0x26   :  { %p891_p1 = scmp.ne.s32.totalorder %s60_s18, %s890_s19  ;;  %p896_p3 = scmp.lt.s32.totalorder %s890_s19, %s890_s19 }
  0x28   :  { %p897_p4 = por %p896_p3, %p895_p2 }
  0x2a   :  { %p898_p5 = pnand %p897_p4, %p891_p1 }
  0x2c   :  { %901 = shalt.err (!%p898_p5)
}
  0x2d   :  { %s936_s0 = smov 256   ;;  %s937_s20 = smov 16  }
  0x2e   :  { %65 = dma.hbm_to_vmem [thread:$0]  %s1011_s5, 4096, %s60_s18, [#allocation9], %s936_s0, %s936_s0, %s937_s20  }
  0x2f   :  { %922 = dma.done.wait [#allocation3], 128  }
  0x30   :  { %923 = vsyncadd [#allocation3], 4294967168 }
  0x31   :  { %924 = dma.done.wait [#allocation6], 2048  }
  0x32   :  { %925 = vsyncadd [#allocation6], 4294965248 }
  0x33   :  { %926 = dma.done.wait [#allocation9], 4096  }
  0x34   :  { %927 = vsyncadd [#allocation9], 4294963200  ;;  %v938_v0 = vmov 0.0   ;;  %vm939_vm0 = vmmov 0   ;;  %v750_v1 = vld [vmem:[#allocation5 + $0x38] sm:$0xff]   ;;  %v751_v2 = vld [vmem:[#allocation5 + $0x30] sm:$0xff]  }
  0x35   :  { %698 = vmatprep.subr.bf16.mxu0 %v938_v0  ;;  %714 = vmatprep.mubr.msk.bf16.mxu0 %vm939_vm0, %v938_v0  ;;  %v752_v3 = vld [vmem:[#allocation5 + $0x28] sm:$0xff]   ;;  %v758_v4 = vld [vmem:[#allocation7 + $0x38] sm:$0xff]   ;;  %v753_v5 = vld [vmem:[#allocation5 + $0x20] sm:$0xff]   ;;  %v940_v59 = vmov 0  }
  0x36   :  { %718 = vmatprep.subr.bf16.mxu1 %v938_v0  ;;  %734 = vmatprep.mubr.msk.bf16.mxu1 %vm939_vm0, %v938_v0  ;;  %v759_v6 = vld [vmem:[#allocation7 + $0x30] sm:$0xff]   ;;  %v754_v7 = vld [vmem:[#allocation5 + $0x18] sm:$0xff]   ;;  %v760_v8 = vld [vmem:[#allocation7 + $0x28] sm:$0xff]  }
  0x37   :  { %699 = vmatpush3.bf16.msra.mxu0 %v750_v1  ;;  %719 = vmatpush3.bf16.msra.mxu1 %v758_v4  ;;  %v755_v9 = vld [vmem:[#allocation5 + $0x10] sm:$0xff]   ;;  %v761_v10 = vld [vmem:[#allocation7 + $0x20] sm:$0xff]   ;;  %v756_v11 = vld [vmem:[#allocation5 + $0x8] sm:$0xff]   ;;  %v343_v4 = vlaneseq }
  0x38   :  { %700 = vmatprep.subr.bf16.mxu0 %v938_v0  ;;  %720 = vmatprep.subr.bf16.mxu1 %v938_v0  ;;  %v762_v12 = vld [vmem:[#allocation7 + $0x18] sm:$0xff]   ;;  %v757_v13 = vld [vmem:[#allocation5] sm:$0xff]   ;;  %v763_v15 = vld [vmem:[#allocation7 + $0x10] sm:$0xff]  }
  0x39   :  { %v81_v14 = vld [vmem:[#allocation2] sm:$0xff]  ;;  %v764_v17 = vld [vmem:[#allocation7 + $0x8] sm:$0xff]   ;;  %v765_v18 = vld [vmem:[#allocation7] sm:$0xff]  }
  0x3a   :  { %v99_v16 = vpack.c.bf16 %v81_v14, %v81_v14  ;;  %v766_v19 = vld [vmem:[#allocation8 + $0xe0] ss:$16 sps:$4 sm:$0xff]   ;;  %v768_v20 = vld [vmem:[#allocation8 + $0xe4] ss:$16 sps:$4 sm:$0xff]   ;;  %v771_v21 = vld [vmem:[#allocation8 + $0xec] ss:$16 sps:$4 sm:$0xff]  }
  0x3b   :  { %701 = vmatpush3.bf16.msra.mxu0 %v751_v2  ;;  %721 = vmatpush3.bf16.msra.mxu1 %v759_v6  ;;  %v774_v22 = vld [vmem:[#allocation8 + $0xc4] ss:$16 sps:$4 sm:$0xff]   ;;  %v772_v23 = vld [vmem:[#allocation8 + $0xc0] ss:$16 sps:$4 sm:$0xff]   ;;  %v630_v34 = vld [vmem:[%s1008_s2] ss:$0 sm:$0xff] }
  0x3c   :  { %702 = vmatprep.subr.bf16.mxu0 %v938_v0  ;;  %722 = vmatprep.subr.bf16.mxu1 %v938_v0  ;;  %v780_v24 = vld [vmem:[#allocation8 + $0xa4] ss:$16 sps:$4 sm:$0xff]   ;;  %v778_v25 = vld [vmem:[#allocation8 + $0xa0] ss:$16 sps:$4 sm:$0xff]   ;;  %v769_v40 = vld [vmem:[#allocation8 + $0xe8] ss:$16 sps:$4 sm:$0xff]  }
  0x3d   :  { %v786_v26 = vld [vmem:[#allocation8 + $0x84] ss:$16 sps:$4 sm:$0xff]   ;;  %v784_v27 = vld [vmem:[#allocation8 + $0x80] ss:$16 sps:$4 sm:$0xff]   ;;  %v777_v42 = vld [vmem:[#allocation8 + $0xcc] ss:$16 sps:$4 sm:$0xff]  }
  0x3e   :  { %v792_v28 = vld [vmem:[#allocation8 + $0x64] ss:$16 sps:$4 sm:$0xff]   ;;  %v790_v29 = vld [vmem:[#allocation8 + $0x60] ss:$16 sps:$4 sm:$0xff]   ;;  %v775_v44 = vld [vmem:[#allocation8 + $0xc8] ss:$16 sps:$4 sm:$0xff]  }
  0x3f   :  { %703 = vmatpush3.bf16.msra.mxu0 %v752_v3  ;;  %723 = vmatpush3.bf16.msra.mxu1 %v760_v8  ;;  %v798_v30 = vld [vmem:[#allocation8 + $0x44] ss:$16 sps:$4 sm:$0xff]   ;;  %v796_v31 = vld [vmem:[#allocation8 + $0x40] ss:$16 sps:$4 sm:$0xff]   ;;  %v783_v45 = vld [vmem:[#allocation8 + $0xac] ss:$16 sps:$4 sm:$0xff]  }
  0x40   :  { %704 = vmatprep.subr.bf16.mxu0 %v938_v0  ;;  %724 = vmatprep.subr.bf16.mxu1 %v938_v0  ;;  %v804_v32 = vld [vmem:[#allocation8 + $0x24] ss:$16 sps:$4 sm:$0xff]   ;;  %v802_v33 = vld [vmem:[#allocation8 + $0x20] ss:$16 sps:$4 sm:$0xff]   ;;  %v781_v46 = vld [vmem:[#allocation8 + $0xa8] ss:$16 sps:$4 sm:$0xff]  }
  0x41   :  { %v789_v47 = vld [vmem:[#allocation8 + $0x8c] ss:$16 sps:$4 sm:$0xff]   ;;  %v787_v48 = vld [vmem:[#allocation8 + $0x88] ss:$16 sps:$4 sm:$0xff]   ;;  %v810_v55 = vld [vmem:[#allocation8 + $0x4] ss:$16 sps:$4 sm:$0xff]  }
  0x42   :  { %v795_v49 = vld [vmem:[#allocation8 + $0x6c] ss:$16 sps:$4 sm:$0xff]   ;;  %v793_v50 = vld [vmem:[#allocation8 + $0x68] ss:$16 sps:$4 sm:$0xff]   ;;  %v808_v57 = vld [vmem:[#allocation8] ss:$16 sps:$4 sm:$0xff]  }
  0x43   :  { %705 = vmatpush3.bf16.msra.mxu0 %v753_v5  ;;  %725 = vmatpush3.bf16.msra.mxu1 %v761_v10  ;;  %v801_v51 = vld [vmem:[#allocation8 + $0x4c] ss:$16 sps:$4 sm:$0xff]   ;;  %v799_v52 = vld [vmem:[#allocation8 + $0x48] ss:$16 sps:$4 sm:$0xff]   ;;  %v344_v5 = vshrl.u32 %v343_v4, 7 }
  0x44   :  { %706 = vmatprep.subr.bf16.mxu0 %v938_v0  ;;  %726 = vmatprep.subr.bf16.mxu1 %v938_v0  ;;  %v807_v53 = vld [vmem:[#allocation8 + $0x2c] ss:$16 sps:$4 sm:$0xff]   ;;  %v805_v54 = vld [vmem:[#allocation8 + $0x28] ss:$16 sps:$4 sm:$0xff]  }
  0x45   :  { %v813_v56 = vld [vmem:[#allocation8 + $0xc] ss:$16 sps:$4 sm:$0xff]   ;;  %v811_v58 = vld [vmem:[#allocation8 + $0x8] ss:$16 sps:$4 sm:$0xff]   ;;  %v345_v6 = vsub.s32 0, %v344_v5  ;;  %v357_v10 = vsub.s32 3, %v344_v5 }
  0x46   :  { %v639_v60 = vld [vmem:[%s1010_s4] ss:$0 sm:$0xff]  ;;  %s941_s4 = smov [#allocation10]  }
  0x47   :  { %707 = vmatpush3.bf16.msra.mxu0 %v754_v7  ;;  %727 = vmatpush3.bf16.msra.mxu1 %v762_v12  ;;  %v353_v7 = vsub.s32 2, %v344_v5  ;;  %v340_v8 = vld [vmem:[%s1012_s6] sm:$0xf]  ;;  %s619_s6 = sshll.u32 %s941_s4, 4  ;;  %s620_s6 = int_to_ptr.vmem [resolvable:$true] %s619_s6 }
  0x48   :  { %708 = vmatprep.subr.bf16.mxu0 %v938_v0  ;;  %728 = vmatprep.subr.bf16.mxu1 %v938_v0  ;;  %v358_v14 = vrot.slane %v340_v8, %v357_v10  ;;  %s902_s26 = scalar_lea.vmem %s620_s6, 512  ;;  %p907_p7 = scmp.lt.s32.totalorder %s620_s6, %s620_s6 }
  0x49   :  { %v354_v12 = vrot.slane %v340_v8, %v353_v7  ;;  %p903_p6 = scmp.ne.s32.totalorder %s620_s6, %s902_s26  ;;  %p908_p8 = scmp.lt.s32.totalorder %s902_s26, %s902_s26 }
  0x4b   :  { %709 = vmatpush3.bf16.msra.mxu0 %v755_v9  ;;  %729 = vmatpush3.bf16.msra.mxu1 %v763_v15  ;;  %v349_v9 = vsub.s32 1, %v344_v5  ;;  %p909_p9 = por %p908_p8, %p907_p7 }
  0x4c   :  { %710 = vmatprep.subr.bf16.mxu0 %v938_v0  ;;  %730 = vmatprep.subr.bf16.mxu1 %v938_v0 }
  0x4d   :  { %p910_p10 = pnand %p909_p9, %p903_p6 }
  0x4f   :  { %711 = vmatpush3.bf16.msra.mxu0 %v756_v11  ;;  %731 = vmatpush3.bf16.msra.mxu1 %v764_v17  ;;  %v346_v11 = vrot.slane %v340_v8, %v345_v6 }
  0x50   :  { %712 = vmatprep.subr.bf16.mxu0 %v938_v0  ;;  %732 = vmatprep.subr.bf16.mxu1 %v938_v0 }
  0x53   :  { %713 = vmatpush3.bf16.msra.mxu0 %v757_v13  ;;  %733 = vmatpush3.bf16.msra.mxu1 %v765_v18  ;;  %v350_v13 = vrot.slane %v340_v8, %v349_v9 }
  0x54   :  { %523 = vmatprep.subr.bf16.mxu0 %v768_v20  ;;  %564 = vmatprep.subr.bf16.mxu1 %v771_v21 }
  0x56   :  { %715 = vmatmul.mubr.bf16.vlgmr.msra.gmra.mxu0 %v99_v16 }
  0x57   :  { %524 = vmatpush1.bf16.msra.mxu0 %v766_v19  ;;  %555 = vmatprep.mubr.bf16.mxu0 %v940_v59 }
  0x58   :  { %525 = vmatprep.subr.bf16.mxu0 %v774_v22 }
  0x5b   :  { %526 = vmatpush1.bf16.msra.mxu0 %v772_v23 }
  0x5c   :  { %527 = vmatprep.subr.bf16.mxu0 %v780_v24 }
  0x5f   :  { %528 = vmatpush1.bf16.msra.mxu0 %v778_v25 }
  0x60   :  { %529 = vmatprep.subr.bf16.mxu0 %v786_v26 }
  0x63   :  { %530 = vmatpush1.bf16.msra.mxu0 %v784_v27 }
  0x64   :  { %531 = vmatprep.subr.bf16.mxu0 %v792_v28 }
  0x67   :  { %532 = vmatpush1.bf16.msra.mxu0 %v790_v29 }
  0x68   :  { %533 = vmatprep.subr.bf16.mxu0 %v798_v30 }
  0x6b   :  { %534 = vmatpush1.bf16.msra.mxu0 %v796_v31 }
  0x6c   :  { %535 = vmatprep.subr.bf16.mxu0 %v804_v32 }
  0x6f   :  { %536 = vmatpush1.bf16.msra.mxu0 %v802_v33 }
  0x70   :  { %537 = vmatprep.subr.bf16.mxu0 %v810_v55 }
  0x73   :  { %538 = vmatpush1.bf16.msra.mxu0 %v808_v57 }
 0x116   :  { %v188_v35 = vpop.f32.mrf.mxu0 }
 0x117   :  { %v189_v36 = vadd.f32 %v630_v34, %v188_v35 }
 0x118   :  { %v716_v37 = vpop.f32.mrf.mxu0 }
 0x119   :  { %v194_v38 = vmax.f32 %v189_v36, 0.0 }
 0x11a   :  { %v191_v39 = vpop.f32.mrf.mxu0 }
 0x11b   :  { %v212_v41 = vpack.c.bf16 %v194_v38, %v194_v38 }
 0x11c   :  { %v717_v43 = vpop.f32.mrf.mxu0 }
 0x11d   :  { %735 = vmatmul.mubr.bf16.vlgmr.msra.gmra.mxu1 %v212_v41 }
 0x11e   :  { %565 = vmatpush1.bf16.msra.mxu1 %v769_v40  ;;  %596 = vmatprep.mubr.bf16.mxu1 %v940_v59 }
 0x11f   :  { %566 = vmatprep.subr.bf16.mxu1 %v777_v42 }
 0x122   :  { %567 = vmatpush1.bf16.msra.mxu1 %v775_v44 }
 0x123   :  { %568 = vmatprep.subr.bf16.mxu1 %v783_v45 }
 0x126   :  { %569 = vmatpush1.bf16.msra.mxu1 %v781_v46 }
 0x127   :  { %570 = vmatprep.subr.bf16.mxu1 %v789_v47 }
 0x12a   :  { %571 = vmatpush1.bf16.msra.mxu1 %v787_v48 }
 0x12b   :  { %572 = vmatprep.subr.bf16.mxu1 %v795_v49 }
 0x12e   :  { %573 = vmatpush1.bf16.msra.mxu1 %v793_v50 }
 0x12f   :  { %574 = vmatprep.subr.bf16.mxu1 %v801_v51 }
 0x132   :  { %575 = vmatpush1.bf16.msra.mxu1 %v799_v52 }
 0x133   :  { %576 = vmatprep.subr.bf16.mxu1 %v807_v53 }
 0x136   :  { %577 = vmatpush1.bf16.msra.mxu1 %v805_v54 }
 0x137   :  { %578 = vmatprep.subr.bf16.mxu1 %v813_v56 }
 0x13a   :  { %579 = vmatpush1.bf16.msra.mxu1 %v811_v58 }
 0x1dd   :  { %v301_v61 = vpop.f32.mrf.mxu1 }
 0x1de   :  { %v302_v62 = vadd.f32 %v639_v60, %v301_v61 }
 0x1df   :  { %v736_v63 = vpop.f32.mrf.mxu1 }
 0x1e0   :  { %v307_v0 = vmax.f32 %v302_v62, 0.0 }
 0x1e1   :  { %v304_v1 = vpop.f32.mrf.mxu1 }
 0x1e2   :  { %v341_v2 = vpack.c.bf16 %v307_v0, %v307_v0 }
 0x1e3   :  { %v737_v3 = vpop.f32.mrf.mxu1 }
 0x1e4   :  { %556 = vmatmul.mubr.bf16.vlgmr.msra.gmra.mxu0 %v341_v2  ;;  %597 = vmatmul.mubr.bf16.vlgmr.msra.gmra.mxu1 %v341_v2 }
 0x2a4   :  { %v557_v15 = vpop.f32.mrf.mxu0  ;;  %v598_v16 = vpop.f32.mrf.mxu1 }
 0x2a5   :  { %v558_v17 = vadd.f32 %v557_v15, %v346_v11  ;;  %v599_v18 = vadd.f32 %v598_v16, %v354_v12 }
 0x2a6   :  { %v559_v19 = vpop.f32.mrf.mxu0  ;;  %v600_v20 = vpop.f32.mrf.mxu1 }
 0x2a7   :  { %814 = vtanh.f32 %v558_v17  ;;  %v560_v21 = vadd.f32 %v559_v19, %v350_v13  ;;  %v601_v22 = vadd.f32 %v600_v20, %v358_v14 }
 0x2a8   :  { %816 = vtanh.f32 %v599_v18  ;;  %v561_v23 = vpop.f32.mrf.mxu0  ;;  %v602_v24 = vpop.f32.mrf.mxu1 }
 0x2a9   :  { %818 = vtanh.f32 %v560_v21 }
 0x2aa   :  { %820 = vtanh.f32 %v601_v22  ;;  %v562_v25 = vpop.f32.mrf.mxu0  ;;  %v603_v26 = vpop.f32.mrf.mxu1 }
 0x2b4   :  { %v815_v27 = vpop.eup %814 }
 0x2b5   :  { %v817_v28 = vpop.eup %816  ;;  %609 = vst [vmem:[#allocation10] sm:$0xff] %v815_v27 }
 0x2b6   :  { %v819_v29 = vpop.eup %818  ;;  %611 = vst [vmem:[#allocation10 + $0x10] sm:$0xff] %v817_v28 }
 0x2b7   :  { %v821_v30 = vpop.eup %820  ;;  %610 = vst [vmem:[#allocation10 + $0x8] sm:$0xff] %v819_v29 }
 0x2b8   :  { %612 = vst [vmem:[#allocation10 + $0x18] sm:$0xff] %v821_v30 }
 0x2b9   :  { %913 = shalt.err (!%p910_p10)
}
 0x2ba   :  { %622 = dma.vmem_to_hbm [thread:$0]  %s620_s6, 512, %s1013_s7, [#allocation4]  }
 0x2bb   :  { %928 = dma.done.wait [#allocation4], 512  }
 0x2bc   :  { %929 = vsyncadd [#allocation4], 4294966784 }
 0x2bd   :  { %626 = vsyncpa [#allocation3], 1 }
 0x2be   :  { %627 = vsyncpa [#allocation6], 1 }
 0x2bf   :  { %628 = vsyncpa [#allocation9], 1 }
 0x2c0   :  { %629 = vsyncpa [#allocation4], 1 }

</bundles_post_ra>
